<compile_context>
chip_gen: v7x
topology: tpu7x:2x2x1
jax: 0.10.0
libtpu: 0.0.40
codegen_flags: <defaults>
</compile_context>

<pallas_src>
import functools

import jax
import jax.numpy as jnp
from jax import lax
from jax.experimental import pallas as pl
from jax.experimental.pallas import tpu as pltpu

EPS = 1e-5


def prepare_params(params, *, groups=4, ksize=3, eps=EPS):
    """Fold BN + reshape conv weights into kernel-ready arrays (run once per layer)."""
    F, Cin = params["w1"].shape[:2]
    Cout = params["w2"].shape[0]
    K, G = ksize, groups
    Og, Fg = Cout // G, F // G

    # BN1 folded to per-channel scale/bias (inference mode), applied on the conv path only.
    s1 = params["g1"] / jnp.sqrt(params["v1"] + eps)
    b1 = params["b1"] - params["m1"] * s1

    # BN2 folded; its scale fuses into the 1x1 conv weight (conv is linear), bias stays.
    s2 = params["g2"] / jnp.sqrt(params["v2"] + eps)
    b2 = params["b2"] - params["m2"] * s2
    w1s = params["w1"][:, :, 0, 0] * s2[:, None]                      # (F, Cin)

    # Grouped 3x3 weight (Cout, F//G, K, K) -> block-structured (Cout, K*K*F),
    # tap-major (t = kh*K + kw), zeros across groups.
    w2 = params["w2"].astype(jnp.float32)
    w2_t = jnp.transpose(w2, (2, 3, 0, 1))                            # (K, K, Cout, Fg)
    full = jnp.zeros((K, K, Cout, F), jnp.float32)
    for g in range(G):
        full = full.at[:, :, g * Og:(g + 1) * Og,
                       g * Fg:(g + 1) * Fg].set(w2_t[:, :, g * Og:(g + 1) * Og, :])
    w2_big = jnp.transpose(full.reshape(K * K, Cout, F),
                           (1, 0, 2)).reshape(Cout, K * K * F)

    return {
        "s1": s1.reshape(Cin, 1).astype(jnp.float32),
        "b1": b1.reshape(Cin, 1).astype(jnp.float32),
        "w1": w1s.astype(jnp.float32),
        "b2": b2.reshape(F, 1).astype(jnp.float32),
        "w2": w2_big.astype(jnp.float32),
    }


def _shift_left(a, s):
    """b[:, p] = a[:, p + s] for p < HW - s (wrapped tail values are never consumed)."""
    if s == 0:
        return a
    return jnp.concatenate([a[:, s:], a[:, :s]], axis=-1)


def _compact_rows(a, W, Ho, Wo, row0, col0):
    """Gather the valid (Ho, Wo) window out of a flat (C, H*W) buffer -> (C, Ho*Wo)."""
    rows = [a[:, (row0 + i) * W + col0:(row0 + i) * W + col0 + Wo] for i in range(Ho)]
    return jnp.concatenate(rows, axis=-1)


@functools.partial(jax.jit, static_argnames=("ksize",))
def dense_layer_decoder_pallas(x_nchw, prep, *, ksize=3):
    """Fused _DenseLayerDecoder forward.  x_nchw: (N, Cin, H, W) float32, NCHW."""
    N, Cin, H, W = x_nchw.shape
    Cout = prep["w2"].shape[0]
    K = ksize
    trim = (K - 1) // 2                       # matches the module's center trim (odd K)
    Ho, Wo = H - (K - 1), W - (K - 1)
    HW, HoWo = H * W, Ho * Wo
    Ctot = Cin + Cout

    def kernel(x_ref, s1_ref, b1_ref, w1_ref, b2_ref, w2_ref, o_ref):
        x = x_ref[0]                                                   # (Cin, HW)
        # preact_bna/bn + relu (folded BN) -- conv path only
        y = jnp.maximum(x * s1_ref[...] + b1_ref[...], 0.0)
        # conv1 (1x1, BN2 scale folded into weight) + bias + relu      -> (F, HW)
        z = jnp.dot(w1_ref[...], y, preferred_element_type=jnp.float32)
        z = jnp.maximum(z + b2_ref[...], 0.0)
        # conv2: grouped 3x3 VALID conv as one matmul against the tap-stacked,
        # lane-shifted features (group structure baked into zeros of w2_ref).
        taps = [_shift_left(z, kh * W + kw) for kh in range(K) for kw in range(K)]
        z_stack = jnp.concatenate(taps, axis=0)                        # (K*K*F, HW)
        x1 = jnp.dot(w2_ref[...], z_stack,
                     preferred_element_type=jnp.float32)               # (Cout, HW)
        # Two direct slab stores: trimmed skip path, then conv output (lane-dense).
        o_ref[0, :Cin, :] = _compact_rows(x, W, Ho, Wo, trim, trim)
        o_ref[0, Cin:, :] = _compact_rows(x1, W, Ho, Wo, 0, 0)

    x_flat = x_nchw.reshape(N, Cin, HW).astype(jnp.float32)            # free reshape

    full_spec = lambda a: pl.BlockSpec(a.shape, lambda n: (0,) * a.ndim)
    out = pl.pallas_call(
        kernel,
        out_shape=jax.ShapeDtypeStruct((N, Ctot, HoWo), jnp.float32),
        grid=(N,),
        in_specs=[
            pl.BlockSpec((1, Cin, HW), lambda n: (n, 0, 0)),
            full_spec(prep["s1"]), full_spec(prep["b1"]), full_spec(prep["w1"]),
            full_spec(prep["b2"]), full_spec(prep["w2"]),
        ],
        out_specs=pl.BlockSpec((1, Ctot, HoWo), lambda n: (n, 0, 0)),
        compiler_params=pltpu.CompilerParams(dimension_semantics=("parallel",)),
    )(x_flat, prep["s1"], prep["b1"], prep["w1"], prep["b2"], prep["w2"])

    return out.reshape(N, Ctot, Ho, Wo)                                # free reshape


def dense_layer_decoder_ref(x_nchw, params, *, groups=4):
    """Pure-JAX reference mirroring the PyTorch module (eval mode)."""
    s1 = params["g1"] / jnp.sqrt(params["v1"] + EPS)
    b1 = params["b1"] - params["m1"] * s1
    y = jnp.maximum(x_nchw * s1[None, :, None, None] + b1[None, :, None, None], 0.0)
    z = lax.conv_general_dilated(y, params["w1"], (1, 1), "VALID",
                                 dimension_numbers=("NCHW", "OIHW", "NCHW"))
    s2 = params["g2"] / jnp.sqrt(params["v2"] + EPS)
    b2 = params["b2"] - params["m2"] * s2
    z = jnp.maximum(z * s2[None, :, None, None] + b2[None, :, None, None], 0.0)
    x1 = lax.conv_general_dilated(z, params["w2"], (1, 1), "VALID",
                                  dimension_numbers=("NCHW", "OIHW", "NCHW"),
                                  feature_group_count=groups)
    t = (x_nchw.shape[-1] - x1.shape[-1]) // 2
    xt = x_nchw[:, :, t:-t, t:-t]
    return jnp.concatenate([xt, x1], axis=1)


if __name__ == "__main__":
    # Small shapes consistent with the module:
    #   in_channels=8, num_features=16, out_channels=8 (both divisible by groups=4)
    N, Cin, H, W = 2, 8, 16, 16
    F, Cout, K, G = 16, 8, 3, 4

    key = jax.random.PRNGKey(0)
    k = jax.random.split(key, 10)
    x = jax.random.normal(k[0], (N, Cin, H, W), jnp.float32)

    params = {
        # BN1 (in_channels)
        "g1": 1.0 + 0.1 * jax.random.normal(k[1], (Cin,), jnp.float32),
        "b1": 0.1 * jax.random.normal(k[2], (Cin,), jnp.float32),
        "m1": 0.1 * jax.random.normal(k[3], (Cin,), jnp.float32),
        "v1": jnp.abs(1.0 + 0.1 * jax.random.normal(k[4], (Cin,), jnp.float32)),
        # conv1: (F, Cin, 1, 1), bias=False
        "w1": 0.2 * jax.random.normal(k[5], (F, Cin, 1, 1), jnp.float32),
        # BN2 (num_features)
        "g2": 1.0 + 0.1 * jax.random.normal(k[6], (F,), jnp.float32),
        "b2": 0.1 * jax.random.normal(k[7], (F,), jnp.float32),
        "m2": 0.1 * jax.random.normal(k[8], (F,), jnp.float32),
        "v2": jnp.abs(1.0 + 0.1 * jax.random.normal(k[9], (F,), jnp.float32)),
        # conv2: grouped, (Cout, F//G, K, K), bias=False
        "w2": 0.2 * jax.random.normal(jax.random.PRNGKey(42),
                                      (Cout, F // G, K, K), jnp.float32),
    }

    # Hoisted per-layer parameter preparation (done once, reused across calls).
    prep = prepare_params(params, groups=G, ksize=K)

    out = dense_layer_decoder_pallas(x, prep, ksize=K)
    out = jax.block_until_ready(out)

    ref = dense_layer_decoder_ref(x, params, groups=G)
    ref = jax.block_until_ready(ref)

    assert out.shape == (N, Cin + Cout, H - 2, W - 2), out.shape
    assert jnp.allclose(out, ref, atol=1e-4, rtol=1e-4), \
        float(jnp.max(jnp.abs(out - ref)))
    print("KERNEL_OK")
</pallas_src>

<mosaic_0001>
module attributes {stable_mosaic.version = 11 : i64} {
  func.func @kernel(%arg0: i32, %arg1: memref<1x8x256xf32, #tpu.memory_space<vmem>>, %arg2: memref<8x1xf32, #tpu.memory_space<vmem>>, %arg3: memref<8x1xf32, #tpu.memory_space<vmem>>, %arg4: memref<16x8xf32, #tpu.memory_space<vmem>>, %arg5: memref<16x1xf32, #tpu.memory_space<vmem>>, %arg6: memref<8x144xf32, #tpu.memory_space<vmem>>, %arg7: memref<1x16x196xf32, #tpu.memory_space<vmem>>) attributes {dimension_semantics = [#tpu.dimension_semantics<parallel>], iteration_bounds = array<i64: 2>, scalar_prefetch = 0 : i64, scratch_operands = 0 : i64, tpu.core_type = #tpu.core_type<tc>, window_params = [{transform_indices = @transform_0, window_bounds = array<i64: 1, 8, 256>}, {pipeline_mode = #tpu.pipeline_mode<synchronous>, transform_indices = @transform_1, window_bounds = array<i64: 8, 1>}, {pipeline_mode = #tpu.pipeline_mode<synchronous>, transform_indices = @transform_2, window_bounds = array<i64: 8, 1>}, {pipeline_mode = #tpu.pipeline_mode<synchronous>, transform_indices = @transform_3, window_bounds = array<i64: 16, 8>}, {pipeline_mode = #tpu.pipeline_mode<synchronous>, transform_indices = @transform_4, window_bounds = array<i64: 16, 1>}, {pipeline_mode = #tpu.pipeline_mode<synchronous>, transform_indices = @transform_5, window_bounds = array<i64: 8, 144>}, {transform_indices = @transform_6, window_bounds = array<i64: 1, 16, 196>}]} {
    %c0 = arith.constant 0 : index
    %c0_0 = arith.constant 0 : index
    %c0_1 = arith.constant 0 : index
    %0 = vector.load %arg1[%c0, %c0_0, %c0_1] : memref<1x8x256xf32, #tpu.memory_space<vmem>>, vector<1x8x256xf32>
    %1 = vector.shape_cast %0 : vector<1x8x256xf32> to vector<8x256xf32>
    %c0_2 = arith.constant 0 : index
    %c0_3 = arith.constant 0 : index
    %2 = vector.load %arg2[%c0_2, %c0_3] : memref<8x1xf32, #tpu.memory_space<vmem>>, vector<8x1xf32>
    %3 = vector.broadcast %2 : vector<8x1xf32> to vector<8x256xf32>
    %4 = arith.mulf %1, %3 : vector<8x256xf32>
    %c0_4 = arith.constant 0 : index
    %c0_5 = arith.constant 0 : index
    %5 = vector.load %arg3[%c0_4, %c0_5] : memref<8x1xf32, #tpu.memory_space<vmem>>, vector<8x1xf32>
    %6 = vector.broadcast %5 : vector<8x1xf32> to vector<8x256xf32>
    %7 = arith.addf %4, %6 : vector<8x256xf32>
    %cst = arith.constant 0.000000e+00 : f32
    %8 = vector.broadcast %cst : f32 to vector<8x256xf32>
    %9 = arith.maximumf %7, %8 : vector<8x256xf32>
    %c0_6 = arith.constant 0 : index
    %c0_7 = arith.constant 0 : index
    %10 = vector.load %arg4[%c0_6, %c0_7] : memref<16x8xf32, #tpu.memory_space<vmem>>, vector<16x8xf32>
    %cst_8 = arith.constant dense<0.000000e+00> : vector<16x256xf32>
    %11 = tpu.matmul %10, %9, %cst_8 {dimension_numbers = #tpu.dot_dimension_numbers<[1], [0], [0], [1], [0, 0, 1, 1], [], []>} : vector<16x8xf32>, vector<8x256xf32>, vector<16x256xf32> -> vector<16x256xf32>
    %c0_9 = arith.constant 0 : index
    %c0_10 = arith.constant 0 : index
    %12 = vector.load %arg5[%c0_9, %c0_10] : memref<16x1xf32, #tpu.memory_space<vmem>>, vector<16x1xf32>
    %13 = vector.broadcast %12 : vector<16x1xf32> to vector<16x256xf32>
    %14 = arith.addf %11, %13 : vector<16x256xf32>
    %cst_11 = arith.constant 0.000000e+00 : f32
    %15 = vector.broadcast %cst_11 : f32 to vector<16x256xf32>
    %16 = arith.maximumf %14, %15 : vector<16x256xf32>
    %17 = vector.extract_strided_slice %16 {offsets = [0, 1], sizes = [16, 255], strides = [1, 1]} : vector<16x256xf32> to vector<16x255xf32>
    %18 = vector.extract_strided_slice %16 {offsets = [0, 0], sizes = [16, 1], strides = [1, 1]} : vector<16x256xf32> to vector<16x1xf32>
    %19 = tpu.concatenate %17, %18 in 1 : vector<16x255xf32>, vector<16x1xf32> -> vector<16x256xf32>
    %20 = vector.extract_strided_slice %16 {offsets = [0, 2], sizes = [16, 254], strides = [1, 1]} : vector<16x256xf32> to vector<16x254xf32>
    %21 = vector.extract_strided_slice %16 {offsets = [0, 0], sizes = [16, 2], strides = [1, 1]} : vector<16x256xf32> to vector<16x2xf32>
    %22 = tpu.concatenate %20, %21 in 1 : vector<16x254xf32>, vector<16x2xf32> -> vector<16x256xf32>
    %23 = vector.extract_strided_slice %16 {offsets = [0, 16], sizes = [16, 240], strides = [1, 1]} : vector<16x256xf32> to vector<16x240xf32>
    %24 = vector.extract_strided_slice %16 {offsets = [0, 0], sizes = [16, 16], strides = [1, 1]} : vector<16x256xf32> to vector<16x16xf32>
    %25 = tpu.concatenate %23, %24 in 1 : vector<16x240xf32>, vector<16x16xf32> -> vector<16x256xf32>
    %26 = vector.extract_strided_slice %16 {offsets = [0, 17], sizes = [16, 239], strides = [1, 1]} : vector<16x256xf32> to vector<16x239xf32>
    %27 = vector.extract_strided_slice %16 {offsets = [0, 0], sizes = [16, 17], strides = [1, 1]} : vector<16x256xf32> to vector<16x17xf32>
    %28 = tpu.concatenate %26, %27 in 1 : vector<16x239xf32>, vector<16x17xf32> -> vector<16x256xf32>
    %29 = vector.extract_strided_slice %16 {offsets = [0, 18], sizes = [16, 238], strides = [1, 1]} : vector<16x256xf32> to vector<16x238xf32>
    %30 = vector.extract_strided_slice %16 {offsets = [0, 0], sizes = [16, 18], strides = [1, 1]} : vector<16x256xf32> to vector<16x18xf32>
    %31 = tpu.concatenate %29, %30 in 1 : vector<16x238xf32>, vector<16x18xf32> -> vector<16x256xf32>
    %32 = vector.extract_strided_slice %16 {offsets = [0, 32], sizes = [16, 224], strides = [1, 1]} : vector<16x256xf32> to vector<16x224xf32>
    %33 = vector.extract_strided_slice %16 {offsets = [0, 0], sizes = [16, 32], strides = [1, 1]} : vector<16x256xf32> to vector<16x32xf32>
    %34 = tpu.concatenate %32, %33 in 1 : vector<16x224xf32>, vector<16x32xf32> -> vector<16x256xf32>
    %35 = vector.extract_strided_slice %16 {offsets = [0, 33], sizes = [16, 223], strides = [1, 1]} : vector<16x256xf32> to vector<16x223xf32>
    %36 = vector.extract_strided_slice %16 {offsets = [0, 0], sizes = [16, 33], strides = [1, 1]} : vector<16x256xf32> to vector<16x33xf32>
    %37 = tpu.concatenate %35, %36 in 1 : vector<16x223xf32>, vector<16x33xf32> -> vector<16x256xf32>
    %38 = vector.extract_strided_slice %16 {offsets = [0, 34], sizes = [16, 222], strides = [1, 1]} : vector<16x256xf32> to vector<16x222xf32>
    %39 = vector.extract_strided_slice %16 {offsets = [0, 0], sizes = [16, 34], strides = [1, 1]} : vector<16x256xf32> to vector<16x34xf32>
    %40 = tpu.concatenate %38, %39 in 1 : vector<16x222xf32>, vector<16x34xf32> -> vector<16x256xf32>
    %41 = tpu.concatenate %16, %19, %22, %25, %28, %31, %34, %37, %40 in 0 : vector<16x256xf32>, vector<16x256xf32>, vector<16x256xf32>, vector<16x256xf32>, vector<16x256xf32>, vector<16x256xf32>, vector<16x256xf32>, vector<16x256xf32>, vector<16x256xf32> -> vector<144x256xf32>
    %c0_12 = arith.constant 0 : index
    %c0_13 = arith.constant 0 : index
    %42 = vector.load %arg6[%c0_12, %c0_13] : memref<8x144xf32, #tpu.memory_space<vmem>>, vector<8x144xf32>
    %cst_14 = arith.constant dense<0.000000e+00> : vector<8x256xf32>
    %43 = tpu.matmul %42, %41, %cst_14 {dimension_numbers = #tpu.dot_dimension_numbers<[1], [0], [0], [1], [0, 0, 1, 1], [], []>} : vector<8x144xf32>, vector<144x256xf32>, vector<8x256xf32> -> vector<8x256xf32>
    %44 = vector.extract_strided_slice %1 {offsets = [0, 17], sizes = [8, 14], strides = [1, 1]} : vector<8x256xf32> to vector<8x14xf32>
    %45 = vector.extract_strided_slice %1 {offsets = [0, 33], sizes = [8, 14], strides = [1, 1]} : vector<8x256xf32> to vector<8x14xf32>
    %46 = vector.extract_strided_slice %1 {offsets = [0, 49], sizes = [8, 14], strides = [1, 1]} : vector<8x256xf32> to vector<8x14xf32>
    %47 = vector.extract_strided_slice %1 {offsets = [0, 65], sizes = [8, 14], strides = [1, 1]} : vector<8x256xf32> to vector<8x14xf32>
    %48 = vector.extract_strided_slice %1 {offsets = [0, 81], sizes = [8, 14], strides = [1, 1]} : vector<8x256xf32> to vector<8x14xf32>
    %49 = vector.extract_strided_slice %1 {offsets = [0, 97], sizes = [8, 14], strides = [1, 1]} : vector<8x256xf32> to vector<8x14xf32>
    %50 = vector.extract_strided_slice %1 {offsets = [0, 113], sizes = [8, 14], strides = [1, 1]} : vector<8x256xf32> to vector<8x14xf32>
    %51 = vector.extract_strided_slice %1 {offsets = [0, 129], sizes = [8, 14], strides = [1, 1]} : vector<8x256xf32> to vector<8x14xf32>
    %52 = vector.extract_strided_slice %1 {offsets = [0, 145], sizes = [8, 14], strides = [1, 1]} : vector<8x256xf32> to vector<8x14xf32>
    %53 = vector.extract_strided_slice %1 {offsets = [0, 161], sizes = [8, 14], strides = [1, 1]} : vector<8x256xf32> to vector<8x14xf32>
    %54 = vector.extract_strided_slice %1 {offsets = [0, 177], sizes = [8, 14], strides = [1, 1]} : vector<8x256xf32> to vector<8x14xf32>
    %55 = vector.extract_strided_slice %1 {offsets = [0, 193], sizes = [8, 14], strides = [1, 1]} : vector<8x256xf32> to vector<8x14xf32>
    %56 = vector.extract_strided_slice %1 {offsets = [0, 209], sizes = [8, 14], strides = [1, 1]} : vector<8x256xf32> to vector<8x14xf32>
    %57 = vector.extract_strided_slice %1 {offsets = [0, 225], sizes = [8, 14], strides = [1, 1]} : vector<8x256xf32> to vector<8x14xf32>
    %58 = tpu.concatenate %44, %45, %46, %47, %48, %49, %50, %51, %52, %53, %54, %55, %56, %57 in 1 : vector<8x14xf32>, vector<8x14xf32>, vector<8x14xf32>, vector<8x14xf32>, vector<8x14xf32>, vector<8x14xf32>, vector<8x14xf32>, vector<8x14xf32>, vector<8x14xf32>, vector<8x14xf32>, vector<8x14xf32>, vector<8x14xf32>, vector<8x14xf32>, vector<8x14xf32> -> vector<8x196xf32>
    %c0_15 = arith.constant 0 : index
    %c0_16 = arith.constant 0 : index
    %c0_17 = arith.constant 0 : index
    %59 = vector.load %arg7[%c0_15, %c0_16, %c0_17] : memref<1x16x196xf32, #tpu.memory_space<vmem>>, vector<1x8x196xf32>
    %60 = vector.shape_cast %59 : vector<1x8x196xf32> to vector<8x196xf32>
    %61 = vector.shape_cast %58 : vector<8x196xf32> to vector<1x8x196xf32>
    tpu.vector_store %arg7[%c0_15, %c0_16, %c0_17], %61 {strides = array<i32>} : memref<1x16x196xf32, #tpu.memory_space<vmem>>, vector<1x8x196xf32>,
    %62 = vector.extract_strided_slice %43 {offsets = [0, 0], sizes = [8, 14], strides = [1, 1]} : vector<8x256xf32> to vector<8x14xf32>
    %63 = vector.extract_strided_slice %43 {offsets = [0, 16], sizes = [8, 14], strides = [1, 1]} : vector<8x256xf32> to vector<8x14xf32>
    %64 = vector.extract_strided_slice %43 {offsets = [0, 32], sizes = [8, 14], strides = [1, 1]} : vector<8x256xf32> to vector<8x14xf32>
    %65 = vector.extract_strided_slice %43 {offsets = [0, 48], sizes = [8, 14], strides = [1, 1]} : vector<8x256xf32> to vector<8x14xf32>
    %66 = vector.extract_strided_slice %43 {offsets = [0, 64], sizes = [8, 14], strides = [1, 1]} : vector<8x256xf32> to vector<8x14xf32>
    %67 = vector.extract_strided_slice %43 {offsets = [0, 80], sizes = [8, 14], strides = [1, 1]} : vector<8x256xf32> to vector<8x14xf32>
    %68 = vector.extract_strided_slice %43 {offsets = [0, 96], sizes = [8, 14], strides = [1, 1]} : vector<8x256xf32> to vector<8x14xf32>
    %69 = vector.extract_strided_slice %43 {offsets = [0, 112], sizes = [8, 14], strides = [1, 1]} : vector<8x256xf32> to vector<8x14xf32>
    %70 = vector.extract_strided_slice %43 {offsets = [0, 128], sizes = [8, 14], strides = [1, 1]} : vector<8x256xf32> to vector<8x14xf32>
    %71 = vector.extract_strided_slice %43 {offsets = [0, 144], sizes = [8, 14], strides = [1, 1]} : vector<8x256xf32> to vector<8x14xf32>
    %72 = vector.extract_strided_slice %43 {offsets = [0, 160], sizes = [8, 14], strides = [1, 1]} : vector<8x256xf32> to vector<8x14xf32>
    %73 = vector.extract_strided_slice %43 {offsets = [0, 176], sizes = [8, 14], strides = [1, 1]} : vector<8x256xf32> to vector<8x14xf32>
    %74 = vector.extract_strided_slice %43 {offsets = [0, 192], sizes = [8, 14], strides = [1, 1]} : vector<8x256xf32> to vector<8x14xf32>
    %75 = vector.extract_strided_slice %43 {offsets = [0, 208], sizes = [8, 14], strides = [1, 1]} : vector<8x256xf32> to vector<8x14xf32>
    %76 = tpu.concatenate %62, %63, %64, %65, %66, %67, %68, %69, %70, %71, %72, %73, %74, %75 in 1 : vector<8x14xf32>, vector<8x14xf32>, vector<8x14xf32>, vector<8x14xf32>, vector<8x14xf32>, vector<8x14xf32>, vector<8x14xf32>, vector<8x14xf32>, vector<8x14xf32>, vector<8x14xf32>, vector<8x14xf32>, vector<8x14xf32>, vector<8x14xf32>, vector<8x14xf32> -> vector<8x196xf32>
    %c0_18 = arith.constant 0 : index
    %c8 = arith.constant 8 : index
    %c0_19 = arith.constant 0 : index
    %77 = vector.load %arg7[%c0_18, %c8, %c0_19] : memref<1x16x196xf32, #tpu.memory_space<vmem>>, vector<1x8x196xf32>
    %78 = vector.shape_cast %77 : vector<1x8x196xf32> to vector<8x196xf32>
    %79 = vector.shape_cast %76 : vector<8x196xf32> to vector<1x8x196xf32>
    tpu.vector_store %arg7[%c0_18, %c8, %c0_19], %79 {strides = array<i32>} : memref<1x16x196xf32, #tpu.memory_space<vmem>>, vector<1x8x196xf32>,
    return
  }
  func.func @transform_0(%arg0: i32) -> (i32, i32, i32) {
    %c0_i32 = arith.constant 0 : i32
    %c0_i32_0 = arith.constant 0 : i32
    %c0_i32_1 = arith.constant 0 : i32
    return %arg0, %c0_i32, %c0_i32_0 : i32, i32, i32
  }
  func.func @transform_1(%arg0: i32) -> (i32, i32) {
    %c0_i32 = arith.constant 0 : i32
    %c0_i32_0 = arith.constant 0 : i32
    %c0_i32_1 = arith.constant 0 : i32
    return %c0_i32, %c0_i32_0 : i32, i32
  }
  func.func @transform_2(%arg0: i32) -> (i32, i32) {
    %c0_i32 = arith.constant 0 : i32
    %c0_i32_0 = arith.constant 0 : i32
    %c0_i32_1 = arith.constant 0 : i32
    return %c0_i32, %c0_i32_0 : i32, i32
  }
  func.func @transform_3(%arg0: i32) -> (i32, i32) {
    %c0_i32 = arith.constant 0 : i32
    %c0_i32_0 = arith.constant 0 : i32
    %c0_i32_1 = arith.constant 0 : i32
    return %c0_i32, %c0_i32_0 : i32, i32
  }
  func.func @transform_4(%arg0: i32) -> (i32, i32) {
    %c0_i32 = arith.constant 0 : i32
    %c0_i32_0 = arith.constant 0 : i32
    %c0_i32_1 = arith.constant 0 : i32
    return %c0_i32, %c0_i32_0 : i32, i32
  }
  func.func @transform_5(%arg0: i32) -> (i32, i32) {
    %c0_i32 = arith.constant 0 : i32
    %c0_i32_0 = arith.constant 0 : i32
    %c0_i32_1 = arith.constant 0 : i32
    return %c0_i32, %c0_i32_0 : i32, i32
  }
  func.func @transform_6(%arg0: i32) -> (i32, i32, i32) {
    %c0_i32 = arith.constant 0 : i32
    %c0_i32_0 = arith.constant 0 : i32
    %c0_i32_1 = arith.constant 0 : i32
    return %arg0, %c0_i32, %c0_i32_0 : i32, i32, i32
  }
}

</mosaic_0001>

<bundles_post_ra>
// kernel: dense_layer_decoder_pallas.1
= control target key start
LH: loop header
LB: loop body
LE: loop exit
PB: predicated region body
PF: predicated region fallthrough
CT: control target
= control target key end

     0   :  { %s1038_s21 = smov 0   ;;  %s1165_s0 = inlined_call_operand.vmem [shape: f32[2,8,256], index: 0, kind: input, shape index: {}]   ;;  %s1166_s1 = inlined_call_operand.vmem [shape: f32[8,1], index: 1, kind: input, shape index: {}]   ;;  %s1167_s2 = inlined_call_operand.vmem [shape: f32[8,1], index: 2, kind: input, shape index: {}]   ;;  %s1168_s3 = inlined_call_operand.vmem [shape: f32[16,8], index: 3, kind: input, shape index: {}]   ;;  %s1169_s4 = inlined_call_operand.vmem [shape: f32[16,1], index: 4, kind: input, shape index: {}]   ;;  %s1170_s5 = inlined_call_operand.vmem [shape: f32[8,144], index: 5, kind: input, shape index: {}]   ;;  %s1171_s6 = inlined_call_operand.vmem [shape: f32[2,16,196], index: 6, kind: output, shape index: {}]  }
   0x1 LB: > { %s789_s22 = sadd.s32 4294967295, %s969_s21   ;;  %p793_p0 = scmp.ge.s32.totalorder %s969_s21, 1  ;;  %s969_s21 = sphi %s1038_s21, %s16_s21  }
   0x2   : > { %p212_p1 = scmp.lt.s32.totalorder %s969_s21, 3 }
   0x4   : > { %p213_p2 = pnand %p793_p0, %p212_p1 }
   0x5   : > { %v254_v0 = vld [vmem:[%s1166_s1] sm:$0xff] (!%p213_p2)  ;;  %v971_v1 = vmov (!%p213_p2), 0   ;;  %v972_v3 = vmov (!%p213_p2), 0.0   ;;  %v275_v5 = vld [vmem:[%s1169_s4 + $0x8] sm:$0xff] (!%p213_p2)  ;;  %p242_p3 = scmp.lt.s32.totalorder (!%p213_p2), %s789_s22, 1  ;;  %vm286_vm0 = vcmask (!%p213_p2), 64512  }
   0x6   : > { %216 = sbr.rel (%p213_p2) target bundleno = 885 (0x375), region = 44  ;;  %881 = vset.pattern.permute.xlu0 (!%p213_p2), %v971_v1  ;;  %882 = vset.pattern.permute.xlu1 (!%p213_p2), %v971_v1  ;;  %v262_v2 = vld [vmem:[%s1167_s2] sm:$0xff] (!%p213_p2)  ;;  %v273_v17 = vld [vmem:[%s1168_s3 + $0x8] sm:$0xff] (!%p213_p2)  ;;  %s973_s15 = smov (!%p213_p2), 127   ;;  %vm532_vm1 = vcmask (!%p213_p2), 130048   ;;  %vm386_vm2 = vcmask (!%p213_p2), 1039360  }
   0x7   : > { %257 = vperm.xlu0 (!%p213_p2), %881, %v254_v0   ;;  %357 = vmatprep.mubr.f32.mxu0 (!%p213_p2), %v972_v3  ;;  %v274_v4 = vld [vmem:[%s1169_s4] sm:$0xff] (!%p213_p2)  ;;  %s974_s16 = smov (!%p213_p2), 126   ;;  %s975_s17 = smov (!%p213_p2), 112   ;;  %v531_v36 = vld [vmem:[%s1170_s5 + $0x8] sm:$0xff] (!%p213_p2)  ;;  %vm405_vm3 = vcmask (!%p213_p2), 1031168   ;;  %vm424_vm4 = vcmask (!%p213_p2), 916480  }
   0x8   : > { %278 = vperm.xlu1 (!%p213_p2), %882, %v274_v4   ;;  %v272_v16 = vld [vmem:[%s1168_s3] sm:$0xff] (!%p213_p2)  ;;  %s976_s18 = smov (!%p213_p2), 111   ;;  %s977_s19 = smov (!%p213_p2), 110   ;;  %800 = vmatprep.mubr.msk.f32.mxu1 (!%p213_p2), %vm532_vm1, %v531_v36  ;;  %vm443_vm5 = vcmask (!%p213_p2), 908288   ;;  %vm462_vm6 = vcmask (!%p213_p2), 900096   ;;  %vm481_vm7 = vcmask (!%p213_p2), 785408  }
   0x9   : > { %s978_s20 = smov (!%p213_p2), 96   ;;  %s979_s23 = smov (!%p213_p2), 95   ;;  %vm500_vm8 = vcmask (!%p213_p2), 777216   ;;  %vm519_vm9 = vcmask (!%p213_p2), 769024   ;;  %vm651_vm10 = vcmask (!%p213_p2), 113664   ;;  %vm653_vm11 = vcmask (!%p213_p2), 228352  }
   0xa   : > { %s980_s26 = smov (!%p213_p2), 94   ;;  %s981_s27 = smov (!%p213_p2), 109   ;;  %vm655_vm12 = vcmask (!%p213_p2), 343040   ;;  %vm657_vm13 = vcmask (!%p213_p2), 457728   ;;  %vm659_vm14 = vcmask (!%p213_p2), 572416   ;;  %vm667_vm15 = vcmask (!%p213_p2), 97280  }
   0xb   : > { %265 = vperm.xlu0 (!%p213_p2), %881, %v262_v2   ;;  %s982_s28 = smov (!%p213_p2), 93   ;;  %s983_s29 = smov (!%p213_p2), 107   ;;  %vm663_vm1 = vcmask (!%p213_p2), 801792  }
   0xc   : > { %283 = vperm.xlu1 (!%p213_p2), %882, %v275_v5   ;;  %s984_s30 = smov (!%p213_p2), 89   ;;  %s986_s8 = smov (!%p213_p2), 87  }
   0xd   : > { %s1173_s22 = smov (!%p242_p3, %s789_s22), 1  ;;  %s987_s9 = smov 103  }
   0xe   : > { %s803_s7 = sshll.u32 %s1173_s22, 4  ;;  %s989_s11 = smov 99  }
   0xf   : > { %s246_s10 = scalar_lea.vmem %s1165_s0, %s803_s7  ;;  %s985_s7 = smov 105  }
  0x10   : > { %v1064_v7 = vld [vmem:[%s246_s10] sm:$0xff]  ;;  %v1066_v8 = vld [vmem:[%s246_s10 + $0x8] sm:$0xff]  ;;  %s988_s10 = smov 101   ;;  %s990_s12 = smov 91  }
  0x11   : > { %s991_s13 = smov 97   ;;  %s992_s25 = smov 114  }
  0x86   : > { %v258_v6 = vpop.permute.xlu0 %257 }
  0x87   : > { %v260_v9 = vmul.f32 %v258_v6, %v1064_v7  ;;  %v261_v10 = vmul.f32 %v258_v6, %v1066_v8  ;;  %v279_v18 = vpop.permute.xlu1 %278 }
  0x8a   : > { %v266_v11 = vpop.permute.xlu0 %265 }
  0x8b   : > { %v268_v12 = vadd.f32 %v266_v11, %v260_v9  ;;  %v269_v13 = vadd.f32 %v266_v11, %v261_v10  ;;  %v284_v24 = vpop.permute.xlu1 %283 }
  0x8d   : > { %v271_v14 = vmax.f32 %v269_v13, 0.0  ;;  %v270_v15 = vmax.f32 %v268_v12, 0.0 }
  0x8f   : > { %293 = vmatprep.subr.mxu0 %v271_v14 }
  0x90   : > { %294 = vmatpush1.msra.mxu0 %v270_v15 }
  0x91   : > { %798 = vmatmul.mubr.msk.f32.vlgmr.msra.gmra.mrb[0].mxu0 %vm286_vm0, %v272_v16 }
  0x92   : > { %363 = vmatprep.mubr.f32.mxu0 %v972_v3 }
  0x95   : > { %799 = vmatmul.mubr.msk.f32.gmra.mrb[2].mxu0 %vm286_vm0, %v273_v17  ;;  %vm661_vm0 = vcmask 687104  }
 0x164   : > { %v359_v19 = vpop.f32.mrb[0].mxu0 }
 0x165   : > { %v360_v20 = vadd.f32 %v359_v19, %v279_v18  ;;  %v361_v21 = vpop.f32.mrb[1].mxu0 }
 0x166   : > { %v362_v22 = vadd.f32 %v361_v21, %v279_v18 }
 0x167   : > { %v370_v23 = vmax.f32 %v360_v20, 0.0 }
 0x168   : > { %v371_v25 = vmax.f32 %v362_v22, 0.0  ;;  %v365_v26 = vpop.f32.mrb[2].mxu0 }
 0x169   : > { %v366_v27 = vadd.f32 %v365_v26, %v284_v24  ;;  %v367_v28 = vpop.f32.mrb[3].mxu0 }
 0x16a   : > { %v368_v29 = vadd.f32 %v367_v28, %v284_v24  ;;  %v883_v30 = vpack.i.bf16 %v371_v25, %v370_v23 }
 0x16b   : > { %v372_v31 = vmax.f32 %v366_v27, 0.0 }
 0x16c   : > { %v373_v32 = vmax.f32 %v368_v29, 0.0  ;;  %884 = vrot.lane.b32.xlu0 %v883_v30, %s973_s15 }
 0x16d   : > { %v807_v33 = vpack.c.bf16 %v372_v31, %v370_v23 }
 0x16e   : > { %v923_v34 = vpack.i.bf16 %v373_v32, %v372_v31  ;;  %v805_v35 = vpack.c.bf16 %v373_v32, %v371_v25 }
 0x170   : > { %924 = vrot.lane.b32.xlu1 %v923_v34, %s973_s15  ;;  %806 = vmatprep.subr.bf16.mxu1 %v805_v35 }
 0x171   : > { %889 = vrot.lane.b32.xlu0 %v883_v30, %s974_s16  ;;  %808 = vmatpush1.bf16.msra.mxu1 %v807_v33 }
 0x174   : > { %929 = vrot.lane.b32.xlu1 %v923_v34, %s974_s16 }
 0x175   : > { %894 = vrot.lane.b32.xlu0 %v883_v30, %s975_s17 }
 0x178   : > { %934 = vrot.lane.b32.xlu1 %v923_v34, %s975_s17 }
 0x179   : > { %899 = vrot.lane.b32.xlu0 %v883_v30, %s976_s18 }
 0x17c   : > { %939 = vrot.lane.b32.xlu1 %v923_v34, %s976_s18 }
 0x17d   : > { %904 = vrot.lane.b32.xlu0 %v883_v30, %s977_s19 }
 0x180   : > { %944 = vrot.lane.b32.xlu1 %v923_v34, %s977_s19 }
 0x181   : > { %909 = vrot.lane.b32.xlu0 %v883_v30, %s978_s20 }
 0x184   : > { %949 = vrot.lane.b32.xlu1 %v923_v34, %s978_s20 }
 0x185   : > { %914 = vrot.lane.b32.xlu0 %v883_v30, %s979_s23 }
 0x188   : > { %954 = vrot.lane.b32.xlu1 %v923_v34, %s979_s23 }
 0x189   : > { %919 = vrot.lane.b32.xlu0 %v883_v30, %s980_s26 }
 0x18c   : > { %959 = vrot.lane.b32.xlu1 %v923_v34, %s980_s26  ;;  %s994_s26 = smov 122  }
 0x18d   : > { %608 = vrot.lane.b32.xlu0 %v1064_v7, %s976_s18  ;;  %s804_s18 = sshll.u32 %s1173_s22, 5  ;;  %s993_s22 = smov 124  }
 0x18e   : > { %s1132_s24 = scalar_lea.vmem %s1171_s6, %s804_s18 }
 0x190   : > { %611 = vrot.lane.b32.xlu1 %v1064_v7, %s981_s27  ;;  %s995_s27 = smov 120  }
 0x191   : > { %636 = vrot.lane.b32.xlu0 %v1066_v8, %s982_s28  ;;  %s996_s28 = smov 85  }
 0x194   : > { %614 = vrot.lane.b32.xlu1 %v1064_v7, %s983_s29  ;;  %s997_s29 = smov 118  }
 0x195   : > { %642 = vrot.lane.b32.xlu0 %v1066_v8, %s984_s30  ;;  %s998_s30 = smov 116  }
 0x198   : > { %617 = vrot.lane.b32.xlu1 %v1064_v7, %s985_s7  ;;  %s999_s7 = smov 108  }
 0x199   : > { %645 = vrot.lane.b32.xlu0 %v1066_v8, %s986_s8  ;;  %s1001_s8 = smov 104  }
 0x19c   : > { %620 = vrot.lane.b32.xlu1 %v1064_v7, %s987_s9 }
 0x1a0   : > { %623 = vrot.lane.b32.xlu1 %v1064_v7, %s988_s10 }
 0x1a4   : > { %626 = vrot.lane.b32.xlu1 %v1064_v7, %s989_s11 }
 0x1a8   : > { %639 = vrot.lane.b32.xlu1 %v1066_v8, %s990_s12 }
 0x1ac   : > { %630 = vrot.lane.b32.xlu1 %v1066_v8, %s991_s13 }
 0x1b0   : > { %633 = vrot.lane.b32.xlu1 %v1066_v8, %s979_s23 }
 0x1de   : > { %v885_v37 = vpop.permute.xlu0 %884 }
 0x1df   : > { %v887_v38 = vunpack.i.h.bf16 %v885_v37  ;;  %v886_v39 = vunpack.i.l.bf16 %v885_v37 }
 0x1e1   : > { %v395_v44 = vsel %vm386_vm2, %v887_v38, %v886_v39  ;;  %v387_v45 = vsel %vm386_vm2, %v886_v39, %v887_v38 }
 0x1e2   : > { %v925_v40 = vpop.permute.xlu1 %924 }
 0x1e3   : > { %v927_v41 = vunpack.i.h.bf16 %v925_v40  ;;  %v926_v42 = vunpack.i.l.bf16 %v925_v40  ;;  %v890_v43 = vpop.permute.xlu0 %889 }
 0x1e4   : > { %v892_v46 = vunpack.i.h.bf16 %v890_v43  ;;  %v891_v47 = vunpack.i.l.bf16 %v890_v43 }
 0x1e5   : > { %v396_v48 = vsel %vm386_vm2, %v927_v41, %v926_v42  ;;  %v388_v49 = vsel %vm386_vm2, %v926_v42, %v927_v41  ;;  %vm669_vm2 = vcmask 211968  }
 0x1e6   : > { %v930_v50 = vpop.permute.xlu1 %929  ;;  %v809_v51 = vpack.c.bf16 %v396_v48, %v395_v44  ;;  %v811_v52 = vpack.c.bf16 %v388_v49, %v387_v45  ;;  %v414_v58 = vsel %vm405_vm3, %v892_v46, %v891_v47  ;;  %v406_v60 = vsel %vm405_vm3, %v891_v47, %v892_v46 }
 0x1e7   : > { %v932_v53 = vunpack.i.h.bf16 %v930_v50  ;;  %v931_v54 = vunpack.i.l.bf16 %v930_v50  ;;  %v895_v55 = vpop.permute.xlu0 %894 }
 0x1e8   : > { %v897_v56 = vunpack.i.h.bf16 %v895_v55  ;;  %v896_v57 = vunpack.i.l.bf16 %v895_v55  ;;  %810 = vmatprep.subr.bf16.mxu1 %v809_v51 }
 0x1e9   : > { %812 = vmatpush1.bf16.msra.mxu1 %v811_v52  ;;  %v415_v59 = vsel %vm405_vm3, %v932_v53, %v931_v54  ;;  %v407_v61 = vsel %vm405_vm3, %v931_v54, %v932_v53 }
 0x1ea   : > { %v935_v62 = vpop.permute.xlu1 %934  ;;  %v813_v63 = vpack.c.bf16 %v415_v59, %v414_v58  ;;  %v815_v0 = vpack.c.bf16 %v407_v61, %v406_v60  ;;  %v433_v4 = vsel %vm424_vm4, %v897_v56, %v896_v57  ;;  %v425_v5 = vsel %vm424_vm4, %v896_v57, %v897_v56 }
 0x1eb   : > { %v937_v1 = vunpack.i.h.bf16 %v935_v62  ;;  %v936_v2 = vunpack.i.l.bf16 %v935_v62  ;;  %v900_v3 = vpop.permute.xlu0 %899 }
 0x1ec   : > { %814 = vmatprep.subr.bf16.mxu1 %v813_v63  ;;  %v902_v6 = vunpack.i.h.bf16 %v900_v3  ;;  %v901_v7 = vunpack.i.l.bf16 %v900_v3 }
 0x1ed   : > { %816 = vmatpush1.bf16.msra.mxu1 %v815_v0  ;;  %v434_v9 = vsel %vm424_vm4, %v937_v1, %v936_v2  ;;  %v426_v10 = vsel %vm424_vm4, %v936_v2, %v937_v1 }
 0x1ee   : > { %v940_v11 = vpop.permute.xlu1 %939  ;;  %v817_v12 = vpack.c.bf16 %v434_v9, %v433_v4  ;;  %v819_v13 = vpack.c.bf16 %v426_v10, %v425_v5  ;;  %v452_v19 = vsel %vm443_vm5, %v902_v6, %v901_v7  ;;  %v444_v21 = vsel %vm443_vm5, %v901_v7, %v902_v6  ;;  %v530_v6 = vld [vmem:[%s1170_s5] sm:$0xff] }
 0x1ef   : > { %v942_v14 = vunpack.i.h.bf16 %v940_v11  ;;  %v941_v15 = vunpack.i.l.bf16 %v940_v11  ;;  %v905_v16 = vpop.permute.xlu0 %904 }
 0x1f0   : > { %v907_v17 = vunpack.i.h.bf16 %v905_v16  ;;  %v906_v18 = vunpack.i.l.bf16 %v905_v16  ;;  %818 = vmatprep.subr.bf16.mxu1 %v817_v12 }
 0x1f1   : > { %820 = vmatpush1.bf16.msra.mxu1 %v819_v13  ;;  %v453_v20 = vsel %vm443_vm5, %v942_v14, %v941_v15  ;;  %v445_v22 = vsel %vm443_vm5, %v941_v15, %v942_v14  ;;  %vm671_vm5 = vcmask 326656  }
 0x1f2   : > { %v945_v23 = vpop.permute.xlu1 %944  ;;  %v821_v24 = vpack.c.bf16 %v453_v20, %v452_v19  ;;  %v823_v25 = vpack.c.bf16 %v445_v22, %v444_v21  ;;  %v471_v29 = vsel %vm462_vm6, %v907_v17, %v906_v18  ;;  %v463_v30 = vsel %vm462_vm6, %v906_v18, %v907_v17 }
 0x1f3   : > { %v947_v26 = vunpack.i.h.bf16 %v945_v23  ;;  %v946_v27 = vunpack.i.l.bf16 %v945_v23  ;;  %v910_v28 = vpop.permute.xlu0 %909 }
 0x1f4   : > { %822 = vmatprep.subr.bf16.mxu1 %v821_v24  ;;  %v912_v31 = vunpack.i.h.bf16 %v910_v28  ;;  %v911_v32 = vunpack.i.l.bf16 %v910_v28 }
 0x1f5   : > { %824 = vmatpush1.bf16.msra.mxu1 %v823_v25  ;;  %v472_v33 = vsel %vm462_vm6, %v947_v26, %v946_v27  ;;  %v464_v34 = vsel %vm462_vm6, %v946_v27, %v947_v26  ;;  %vm673_vm6 = vcmask 441344  }
 0x1f6   : > { %v950_v35 = vpop.permute.xlu1 %949  ;;  %v825_v36 = vpack.c.bf16 %v472_v33, %v471_v29  ;;  %v827_v37 = vpack.c.bf16 %v464_v34, %v463_v30  ;;  %v490_v43 = vsel %vm481_vm7, %v912_v31, %v911_v32  ;;  %v482_v45 = vsel %vm481_vm7, %v911_v32, %v912_v31 }
 0x1f7   : > { %v952_v38 = vunpack.i.h.bf16 %v950_v35  ;;  %v951_v39 = vunpack.i.l.bf16 %v950_v35  ;;  %v915_v40 = vpop.permute.xlu0 %914 }
 0x1f8   : > { %v917_v41 = vunpack.i.h.bf16 %v915_v40  ;;  %v916_v42 = vunpack.i.l.bf16 %v915_v40  ;;  %826 = vmatprep.subr.bf16.mxu1 %v825_v36 }
 0x1f9   : > { %828 = vmatpush1.bf16.msra.mxu1 %v827_v37  ;;  %v491_v44 = vsel %vm481_vm7, %v952_v38, %v951_v39  ;;  %v483_v46 = vsel %vm481_vm7, %v951_v39, %v952_v38  ;;  %vm676_vm7 = vcmask 556032  }
 0x1fa   : > { %v955_v47 = vpop.permute.xlu1 %954  ;;  %v829_v48 = vpack.c.bf16 %v491_v44, %v490_v43  ;;  %v831_v49 = vpack.c.bf16 %v483_v46, %v482_v45  ;;  %v509_v53 = vsel %vm500_vm8, %v917_v41, %v916_v42  ;;  %v501_v54 = vsel %vm500_vm8, %v916_v42, %v917_v41 }
 0x1fb   : > { %v957_v50 = vunpack.i.h.bf16 %v955_v47  ;;  %v956_v51 = vunpack.i.l.bf16 %v955_v47  ;;  %v920_v52 = vpop.permute.xlu0 %919 }
 0x1fc   : > { %830 = vmatprep.subr.bf16.mxu1 %v829_v48  ;;  %v922_v55 = vunpack.i.h.bf16 %v920_v52  ;;  %v921_v56 = vunpack.i.l.bf16 %v920_v52 }
 0x1fd   : > { %832 = vmatpush1.bf16.msra.mxu1 %v831_v49  ;;  %v510_v57 = vsel %vm500_vm8, %v957_v50, %v956_v51  ;;  %v502_v58 = vsel %vm500_vm8, %v956_v51, %v957_v50 }
 0x1fe   : > { %v960_v59 = vpop.permute.xlu1 %959  ;;  %v833_v60 = vpack.c.bf16 %v510_v57, %v509_v53  ;;  %v835_v61 = vpack.c.bf16 %v502_v58, %v501_v54  ;;  %v528_v0 = vsel %vm519_vm9, %v922_v55, %v921_v56  ;;  %v520_v2 = vsel %vm519_vm9, %v921_v56, %v922_v55 }
 0x1ff   : > { %v962_v62 = vunpack.i.h.bf16 %v960_v59  ;;  %v961_v63 = vunpack.i.l.bf16 %v960_v59  ;;  %v609_v11 = vpop.permute.xlu0 %608 }
 0x200   : > { %834 = vmatprep.subr.bf16.mxu1 %v833_v60 }
 0x201   : > { %836 = vmatpush1.bf16.msra.mxu1 %v835_v61  ;;  %v529_v1 = vsel %vm519_vm9, %v962_v62, %v961_v63  ;;  %v521_v3 = vsel %vm519_vm9, %v961_v63, %v962_v62 }
 0x202   : > { %v837_v4 = vpack.c.bf16 %v529_v1, %v528_v0  ;;  %v839_v5 = vpack.c.bf16 %v521_v3, %v520_v2  ;;  %v612_v7 = vpop.permute.xlu1 %611 }
 0x203   : > { %v652_v13 = vsel %vm651_vm10, %v609_v11, %v612_v7  ;;  %v637_v20 = vpop.permute.xlu0 %636 }
 0x204   : > { %838 = vmatprep.subr.bf16.mxu1 %v837_v4 }
 0x205   : > { %840 = vmatpush1.bf16.msra.mxu1 %v839_v5 }
 0x206   : > { %v615_v9 = vpop.permute.xlu1 %614 }
 0x207   : > { %v654_v14 = vsel %vm653_vm11, %v652_v13, %v615_v9  ;;  %v643_v31 = vpop.permute.xlu0 %642 }
 0x208   : > { %601 = vmatmul.mubr.f32.vlgmr.msra.gmra.mrb[0].mxu1 %v530_v6 }
 0x20a   : > { %v618_v10 = vpop.permute.xlu1 %617 }
 0x20b   : > { %v656_v16 = vsel %vm655_vm12, %v654_v14, %v618_v10  ;;  %v646_v32 = vpop.permute.xlu0 %645 }
 0x20e   : > { %v621_v12 = vpop.permute.xlu1 %620 }
 0x20f   : > { %v658_v18 = vsel %vm657_vm13, %v656_v16, %v621_v12 }
 0x212   : > { %v624_v15 = vpop.permute.xlu1 %623 }
 0x213   : > { %v660_v21 = vsel %vm659_vm14, %v658_v18, %v624_v15 }
 0x216   : > { %v627_v17 = vpop.permute.xlu1 %626 }
 0x217   : > { %v662_v23 = vsel %vm661_vm0, %v660_v21, %v627_v17 }
 0x21a   : > { %v640_v19 = vpop.permute.xlu1 %639 }
 0x21b   : > { %v668_v22 = vsel %vm667_vm15, %v637_v20, %v640_v19 }
 0x21c   : > { %v670_v38 = vsel %vm669_vm2, %v668_v22, %v643_v31 }
 0x21d   : > { %v672_v39 = vsel %vm671_vm5, %v670_v38, %v646_v32 }
 0x21e   : > { %v631_v24 = vpop.permute.xlu1 %630 }
 0x21f   : > { %v664_v25 = vsel %vm663_vm1, %v662_v23, %v631_v24 }
 0x222   : > { %v634_v26 = vpop.permute.xlu1 %633 }
 0x223   : > { %v665_v27 = vsel %vm424_vm4, %v664_v25, %v634_v26 }
 0x224   : > { %v666_v28 = vsel %vm405_vm3, %v665_v27, %v637_v20 }
 0x225   : > { %675 = vst [vmem:[%s1132_s24] sm:$0xff] %v666_v28 }
 0x2db   : > { %v602_v29 = vpop.f32.mrb[0].mxu1 }
 0x2dc   : > { %697 = vrot.lane.b32.xlu1 %v602_v29, %s992_s25  ;;  %679 = vrot.lane.b32.xlu0 %v602_v29, %s974_s16  ;;  %v604_v30 = vpop.f32.mrb[1].mxu1  ;;  %s1000_s16 = smov 106  }
 0x2e0   : > { %682 = vrot.lane.b32.xlu0 %v602_v29, %s993_s22  ;;  %704 = vrot.lane.b32.xlu1 %v604_v30, %s977_s19  ;;  %s1002_s19 = smov 102  }
 0x2e4   : > { %685 = vrot.lane.b32.xlu0 %v602_v29, %s994_s26  ;;  %701 = vrot.lane.b32.xlu1 %v604_v30, %s975_s17 }
 0x2e8   : > { %688 = vrot.lane.b32.xlu0 %v602_v29, %s995_s27  ;;  %648 = vrot.lane.b32.xlu1 %v1066_v8, %s996_s28 }
 0x2ec   : > { %691 = vrot.lane.b32.xlu0 %v602_v29, %s997_s29 }
 0x2f0   : > { %694 = vrot.lane.b32.xlu0 %v602_v29, %s998_s30 }
 0x2f4   : > { %707 = vrot.lane.b32.xlu0 %v604_v30, %s999_s7 }
 0x2f8   : > { %710 = vrot.lane.b32.xlu0 %v604_v30, %s1000_s16 }
 0x2fc   : > { %713 = vrot.lane.b32.xlu0 %v604_v30, %s1001_s8 }
 0x300   : > { %716 = vrot.lane.b32.xlu0 %v604_v30, %s1002_s19 }
 0x34e   : > { %v698_v33 = vpop.permute.xlu1 %697  ;;  %v680_v34 = vpop.permute.xlu0 %679 }
 0x34f   : > { %v719_v43 = vsel %vm651_vm10, %v602_v29, %v680_v34 }
 0x352   : > { %v683_v35 = vpop.permute.xlu0 %682  ;;  %v705_v36 = vpop.permute.xlu1 %704 }
 0x353   : > { %v720_v45 = vsel %vm653_vm11, %v719_v43, %v683_v35 }
 0x356   : > { %v686_v8 = vpop.permute.xlu0 %685  ;;  %v702_v37 = vpop.permute.xlu1 %701 }
 0x357   : > { %v721_v46 = vsel %vm655_vm12, %v720_v45, %v686_v8 }
 0x35a   : > { %v689_v40 = vpop.permute.xlu0 %688  ;;  %v649_v41 = vpop.permute.xlu1 %648 }
 0x35b   : > { %v674_v42 = vsel %vm673_vm6, %v672_v39, %v649_v41  ;;  %v722_v47 = vsel %vm657_vm13, %v721_v46, %v689_v40 }
 0x35c   : > { %677 = vst.msk [vmem:[%s1132_s24 + $0x8] sm:$0xff] %vm676_vm7, %v674_v42 }
 0x35e   : > { %v692_v44 = vpop.permute.xlu0 %691 }
 0x35f   : > { %v723_v48 = vsel %vm659_vm14, %v722_v47, %v692_v44 }
 0x362   : > { %v695_v49 = vpop.permute.xlu0 %694 }
 0x363   : > { %v724_v50 = vsel %vm661_vm0, %v723_v48, %v695_v49 }
 0x364   : > { %v725_v51 = vsel %vm663_vm1, %v724_v50, %v698_v33 }
 0x365   : > { %v726_v52 = vsel %vm424_vm4, %v725_v51, %v702_v37 }
 0x366   : > { %v727_v53 = vsel %vm405_vm3, %v726_v52, %v705_v36  ;;  %v708_v54 = vpop.permute.xlu0 %707 }
 0x367   : > { %732 = vst [vmem:[%s1132_s24 + $0x10] sm:$0xff] %v727_v53  ;;  %v728_v57 = vsel %vm667_vm15, %v705_v36, %v708_v54 }
 0x36a   : > { %v711_v55 = vpop.permute.xlu0 %710 }
 0x36b   : > { %v729_v58 = vsel %vm669_vm2, %v728_v57, %v711_v55 }
 0x36e   : > { %v714_v56 = vpop.permute.xlu0 %713 }
 0x36f   : > { %v730_v59 = vsel %vm671_vm5, %v729_v58, %v714_v56 }
 0x372   : > { %v717_v60 = vpop.permute.xlu0 %716 }
 0x373   : > { %v731_v61 = vsel %vm673_vm6, %v730_v59, %v717_v60 }
 0x374   : > { %733 = vst.msk [vmem:[%s1132_s24 + $0x18] sm:$0xff] %vm676_vm7, %v731_v61 }
 0x375 PF: > { %s16_s21 = sadd.s32 1, %s969_s21  }
 0x376   : > { %p13_p4 = scmp.ge.s32.totalorder %s16_s21, 4  }
 0x378   :  { %15 = sbr.rel (!%p13_p4) target bundleno = 1 (0x1), region = 74 }

</bundles_post_ra>
